<compile_context>
chip_gen: v6e
topology: v6e:2x2x1
jax: 0.10.0
libtpu: 0.0.40
codegen_flags: <defaults>
</compile_context>

<pallas_src>
import functools

import jax
import jax.numpy as jnp
from jax.experimental import pallas as pl
from jax.experimental.pallas import tpu as pltpu


def _hard_softmax_kernel_generic(x_ref, o_ref, *, eps, keep_torch_order):
    """Softmax axis spans the whole block row: plain row reductions."""
    x = x_ref[...].astype(jnp.float32)
    row_max = jnp.max(x, axis=-1, keepdims=True)
    e = jnp.exp(x - row_max)
    denom = jnp.sum(e, axis=-1, keepdims=True)
    inv = pl.reciprocal(denom, approx=True)          # EUP slot, not a VALU divide
    y_soft = e * inv
    # max(e) per row is exactly exp(0) == 1, so max(y_soft) == inv; inv appears on
    # both sides of the compare, so its (approximate) error cancels.
    y_hard = jnp.where(y_soft >= inv * jnp.float32(1.0 - eps),
                       jnp.float32(1.0), jnp.float32(0.0))
    out = (y_hard - y_soft) + y_soft if keep_torch_order else y_hard
    o_ref[...] = out.astype(o_ref.dtype)


def _hard_softmax_kernel_packed(bd_ref, x_ref, o_ref, *, seg_width, eps,
                                keep_torch_order):
    """Lane-packed path: each 128-lane row holds 128 // seg_width softmax rows."""
    x = x_ref[...].astype(jnp.float32)
    rt, lanes = x.shape

    # Single-vreg lane index; every butterfly mask derives from it and broadcasts
    # over the row dimension (no (row_tile, lanes) int32 tensors).
    lane = jax.lax.broadcasted_iota(jnp.int32, (1, lanes), 1)

    # Segmented max over aligned groups of `seg_width` lanes via an XOR butterfly.
    # pltpu.roll follows jnp.roll: roll(v, s)[i] == v[i - s].  The XOR partner of
    # lane i at step s is i ^ s (i - s where bit s of i is set, i + s where it is
    # clear), so both a +s and a -s rotation are needed each step (XLU slot); the
    # select uses the single-vreg bit mask.
    seg_max = x
    s = 1
    while s < seg_width:
        bit_set = ((lane >> (s.bit_length() - 1)) & 1) == 1        # (1, lanes)
        partner = jnp.where(bit_set,
                            pltpu.roll(seg_max, s, axis=1),            # v[i - s]
                            pltpu.roll(seg_max, lanes - s, axis=1))    # v[i + s]
        seg_max = jnp.maximum(seg_max, partner)
        s *= 2

    e = jnp.exp(x - seg_max)

    # Segmented sum broadcast back to every lane: one MXU matmul against the
    # block-diagonal ones matrix (hoisted into the wrapper; VMEM-resident across
    # the whole grid via its constant index_map).
    denom = jnp.dot(e, bd_ref[...], preferred_element_type=jnp.float32)

    inv = pl.reciprocal(denom, approx=True)          # EUP slot, not a VALU divide
    y_soft = e * inv
    # max(e) over each segment is exactly exp(0) == 1, so max(y_soft) == inv; inv
    # factors out of both sides of the compare, so its error cannot flip it.
    y_hard = jnp.where(y_soft >= inv * jnp.float32(1.0 - eps),
                       jnp.float32(1.0), jnp.float32(0.0))
    out = (y_hard - y_soft) + y_soft if keep_torch_order else y_hard
    o_ref[...] = out.astype(o_ref.dtype)


def hard_softmax_pallas(x: jax.Array, eps: float = 0.5, *,
                        target_block_bytes: int = 2 << 20,
                        keep_torch_order: bool = True) -> jax.Array:
    """HardSoftmax along the last axis of x (any rank >= 1).

    target_block_bytes: ~2 MiB default; 2-4 MiB is the sweet spot on v7x, and
    v5e/v6e (128 MiB VMEM) take the same tile with a small additional win.
    """
    orig_shape = x.shape
    n = orig_shape[-1]
    if x.size == 0:
        return x

    x2 = x.reshape(-1, n)
    r = x2.shape[0]

    # Lane-dense packing: fold k = 128 // n softmax rows into each 128-lane row
    # when n is a small power of two.  Pad the row count to a multiple of k (a
    # few rows, fused with the packing reshape) instead of falling back to a
    # sub-128-lane output block with masked partial stores.
    packed = (n < 128) and (128 % n == 0) and ((n & (n - 1)) == 0)
    pad_rows = 0
    lanes = n
    seg_width = n
    if packed:
        k = 128 // n
        pad_rows = (-r) % k
        if pad_rows:
            x2 = jnp.pad(x2, ((0, pad_rows), (0, 0)))
        x2 = x2.reshape((r + pad_rows) // k, 128)
        lanes = 128
    # TODO(synk): non-power-of-2 widths <= 64 could also be lane-packed by
    # padding each row with -inf to the next divisor of 128; not implemented.
    rp = x2.shape[0]

    # f32 working bytes of one row (lane dim padded to 128 in VMEM).
    row_bytes = ((lanes + 127) // 128) * 128 * 4
    if min(rp, 8) * row_bytes > (6 << 20):
        # TODO(synk): very wide softmax axes need a two-pass / online-softmax
        # split along the lane axis; not implemented.
        raise NotImplementedError("softmax axis too wide for a single VMEM block")

    # Row tile: as large as the VMEM budget allows (amortizes per-step overhead),
    # but capped so the grid has >= 2 steps whenever rp > 8 -- v7x has two
    # TensorCores and the "parallel" axis only shards across them with >= 2 steps.
    if rp <= 8:
        row_tile = rp                                   # full-dim block
    else:
        budget_rows = max(8, (target_block_bytes // row_bytes) // 8 * 8)
        half_rows = 8 * pl.cdiv(pl.cdiv(rp, 2), 8)
        row_tile = max(8, min(budget_rows, half_rows))

    # No wrapper-side padding of the grid: rows are independent, so the partial
    # boundary block (if any) is clipped by Pallas on writeback.
    grid = (pl.cdiv(rp, row_tile),)

    if packed:
        # Hoisted constant: block-diagonal ones matrix for the segmented sum.
        idx = jnp.arange(lanes, dtype=jnp.int32)
        blockdiag = (idx[:, None] // seg_width ==
                     idx[None, :] // seg_width).astype(jnp.float32)
        kernel = functools.partial(_hard_softmax_kernel_packed,
                                   seg_width=seg_width, eps=float(eps),
                                   keep_torch_order=keep_torch_order)
        in_specs = [
            pl.BlockSpec((lanes, lanes), lambda i: (0, 0)),   # VMEM-resident const
            pl.BlockSpec((row_tile, lanes), lambda i: (i, 0)),
        ]
        operands = (blockdiag, x2)
    else:
        kernel = functools.partial(_hard_softmax_kernel_generic,
                                   eps=float(eps),
                                   keep_torch_order=keep_torch_order)
        in_specs = [pl.BlockSpec((row_tile, lanes), lambda i: (i, 0))]
        operands = (x2,)

    out = pl.pallas_call(
        kernel,
        out_shape=jax.ShapeDtypeStruct((rp, lanes), x.dtype),
        grid_spec=pltpu.PrefetchScalarGridSpec(
            num_scalar_prefetch=0,
            grid=grid,
            in_specs=in_specs,
            out_specs=pl.BlockSpec((row_tile, lanes), lambda i: (i, 0)),
        ),
        compiler_params=pltpu.CompilerParams(
            dimension_semantics=("parallel",),
            vmem_limit_bytes=32 * 1024 * 1024,
        ),
    )(*operands)

    if packed:
        out = out.reshape(rp * (128 // n), n)
        if pad_rows:
            out = out[:r]
    return out.reshape(orig_shape)


def hard_softmax_ref(x: jax.Array, eps: float = 0.5) -> jax.Array:
    """Pure-JAX reference mirroring the PyTorch forward."""
    y_soft = jax.nn.softmax(x, axis=-1)
    val_max = jnp.max(y_soft, axis=-1, keepdims=True)
    y_hard = jnp.where(y_soft >= val_max * (1.0 - eps), 1.0, 0.0)
    return (y_hard - y_soft) + y_soft


if __name__ == "__main__":
    eps = 0.5
    key = jax.random.PRNGKey(0)
    k1, k2, k3 = jax.random.split(key, 3)

    # NCHW input matching the PyTorch module usage (softmax over W=16):
    # lane-packed path, 8 softmax rows folded per 128-lane row, 2 grid steps.
    x = jax.random.normal(k1, (2, 4, 16, 16), dtype=jnp.float32)
    out = jax.block_until_ready(hard_softmax_pallas(x, eps))
    assert out.shape == x.shape and out.dtype == x.dtype
    assert jnp.allclose(out, hard_softmax_ref(x, eps), atol=1e-5, rtol=1e-5), \
        "packed-path mismatch vs reference"

    # Odd flattened row count (15 rows of width 16): exercises the wrapper-side
    # row padding that keeps the lane-packed path instead of falling back.
    x_odd = jax.random.normal(k2, (3, 5, 16), dtype=jnp.float32)
    out_odd = jax.block_until_ready(hard_softmax_pallas(x_odd, eps))
    assert jnp.allclose(out_odd, hard_softmax_ref(x_odd, eps), atol=1e-5, rtol=1e-5), \
        "packed-path (padded rows) mismatch vs reference"

    # Wide softmax axis with a row count that does not divide the row tile:
    # generic path plus the clipped partial boundary block (no jnp.pad).
    x_wide = jax.random.normal(k3, (3, 5, 256), dtype=jnp.float32)
    out_wide = jax.block_until_ready(hard_softmax_pallas(x_wide, eps))
    assert jnp.allclose(out_wide, hard_softmax_ref(x_wide, eps), atol=1e-5, rtol=1e-5), \
        "generic-path mismatch vs reference"

    print("KERNEL_OK")
</pallas_src>

<mosaic_0001>
module attributes {stable_mosaic.version = 11 : i64} {
  func.func @_hard_softmax_kernel_packed(%arg0: i32, %arg1: memref<128x128xf32, #tpu.memory_space<vmem>>, %arg2: memref<8x128xf32, #tpu.memory_space<vmem>>, %arg3: memref<8x128xf32, #tpu.memory_space<vmem>>) attributes {dimension_semantics = [#tpu.dimension_semantics<parallel>], iteration_bounds = array<i64: 2>, scalar_prefetch = 0 : i64, scratch_operands = 0 : i64, tpu.core_type = #tpu.core_type<tc>, window_params = [{pipeline_mode = #tpu.pipeline_mode<synchronous>, transform_indices = @transform_0, window_bounds = array<i64: 128, 128>}, {transform_indices = @transform_1, window_bounds = array<i64: 8, 128>}, {transform_indices = @transform_2, window_bounds = array<i64: 8, 128>}]} {
    %c0 = arith.constant 0 : index
    %c0_0 = arith.constant 0 : index
    %0 = vector.load %arg2[%c0, %c0_0] : memref<8x128xf32, #tpu.memory_space<vmem>>, vector<8x128xf32>
    %1 = tpu.iota {dimensions = array<i32: 1>} : vector<1x128xi32>
    %c0_i32 = arith.constant 0 : i32
    %2 = vector.broadcast %c0_i32 : i32 to vector<1x128xi32>
    %3 = arith.shrsi %1, %2 : vector<1x128xi32>
    %c1_i32 = arith.constant 1 : i32
    %4 = vector.broadcast %c1_i32 : i32 to vector<1x128xi32>
    %5 = arith.andi %3, %4 : vector<1x128xi32>
    %c1_i32_1 = arith.constant 1 : i32
    %6 = vector.broadcast %c1_i32_1 : i32 to vector<1x128xi32>
    %7 = arith.cmpi eq, %5, %6 : vector<1x128xi32>
    %c1_i32_2 = arith.constant 1 : i32
    %8 = tpu.dynamic_rotate %0 by %c1_i32_2 dim 1 : vector<8x128xf32>, i32 -> vector<8x128xf32>
    %c127_i32 = arith.constant 127 : i32
    %9 = tpu.dynamic_rotate %0 by %c127_i32 dim 1 : vector<8x128xf32>, i32 -> vector<8x128xf32>
    %10 = vector.shape_cast %7 : vector<1x128xi1> to vector<1x128xi1>
    %11 = vector.broadcast %10 : vector<1x128xi1> to vector<8x128xi1>
    %12 = arith.select %11, %8, %9 : vector<8x128xi1>, vector<8x128xf32>
    %13 = arith.maximumf %0, %12 : vector<8x128xf32>
    %c1_i32_3 = arith.constant 1 : i32
    %14 = vector.broadcast %c1_i32_3 : i32 to vector<1x128xi32>
    %15 = arith.shrsi %1, %14 : vector<1x128xi32>
    %c1_i32_4 = arith.constant 1 : i32
    %16 = vector.broadcast %c1_i32_4 : i32 to vector<1x128xi32>
    %17 = arith.andi %15, %16 : vector<1x128xi32>
    %c1_i32_5 = arith.constant 1 : i32
    %18 = vector.broadcast %c1_i32_5 : i32 to vector<1x128xi32>
    %19 = arith.cmpi eq, %17, %18 : vector<1x128xi32>
    %c2_i32 = arith.constant 2 : i32
    %20 = tpu.dynamic_rotate %13 by %c2_i32 dim 1 : vector<8x128xf32>, i32 -> vector<8x128xf32>
    %c126_i32 = arith.constant 126 : i32
    %21 = tpu.dynamic_rotate %13 by %c126_i32 dim 1 : vector<8x128xf32>, i32 -> vector<8x128xf32>
    %22 = vector.shape_cast %19 : vector<1x128xi1> to vector<1x128xi1>
    %23 = vector.broadcast %22 : vector<1x128xi1> to vector<8x128xi1>
    %24 = arith.select %23, %20, %21 : vector<8x128xi1>, vector<8x128xf32>
    %25 = arith.maximumf %13, %24 : vector<8x128xf32>
    %c2_i32_6 = arith.constant 2 : i32
    %26 = vector.broadcast %c2_i32_6 : i32 to vector<1x128xi32>
    %27 = arith.shrsi %1, %26 : vector<1x128xi32>
    %c1_i32_7 = arith.constant 1 : i32
    %28 = vector.broadcast %c1_i32_7 : i32 to vector<1x128xi32>
    %29 = arith.andi %27, %28 : vector<1x128xi32>
    %c1_i32_8 = arith.constant 1 : i32
    %30 = vector.broadcast %c1_i32_8 : i32 to vector<1x128xi32>
    %31 = arith.cmpi eq, %29, %30 : vector<1x128xi32>
    %c4_i32 = arith.constant 4 : i32
    %32 = tpu.dynamic_rotate %25 by %c4_i32 dim 1 : vector<8x128xf32>, i32 -> vector<8x128xf32>
    %c124_i32 = arith.constant 124 : i32
    %33 = tpu.dynamic_rotate %25 by %c124_i32 dim 1 : vector<8x128xf32>, i32 -> vector<8x128xf32>
    %34 = vector.shape_cast %31 : vector<1x128xi1> to vector<1x128xi1>
    %35 = vector.broadcast %34 : vector<1x128xi1> to vector<8x128xi1>
    %36 = arith.select %35, %32, %33 : vector<8x128xi1>, vector<8x128xf32>
    %37 = arith.maximumf %25, %36 : vector<8x128xf32>
    %c3_i32 = arith.constant 3 : i32
    %38 = vector.broadcast %c3_i32 : i32 to vector<1x128xi32>
    %39 = arith.shrsi %1, %38 : vector<1x128xi32>
    %c1_i32_9 = arith.constant 1 : i32
    %40 = vector.broadcast %c1_i32_9 : i32 to vector<1x128xi32>
    %41 = arith.andi %39, %40 : vector<1x128xi32>
    %c1_i32_10 = arith.constant 1 : i32
    %42 = vector.broadcast %c1_i32_10 : i32 to vector<1x128xi32>
    %43 = arith.cmpi eq, %41, %42 : vector<1x128xi32>
    %c8_i32 = arith.constant 8 : i32
    %44 = tpu.dynamic_rotate %37 by %c8_i32 dim 1 : vector<8x128xf32>, i32 -> vector<8x128xf32>
    %c120_i32 = arith.constant 120 : i32
    %45 = tpu.dynamic_rotate %37 by %c120_i32 dim 1 : vector<8x128xf32>, i32 -> vector<8x128xf32>
    %46 = vector.shape_cast %43 : vector<1x128xi1> to vector<1x128xi1>
    %47 = vector.broadcast %46 : vector<1x128xi1> to vector<8x128xi1>
    %48 = arith.select %47, %44, %45 : vector<8x128xi1>, vector<8x128xf32>
    %49 = arith.maximumf %37, %48 : vector<8x128xf32>
    %50 = arith.subf %0, %49 : vector<8x128xf32>
    %51 = math.exp %50 : vector<8x128xf32>
    %c0_11 = arith.constant 0 : index
    %c0_12 = arith.constant 0 : index
    %52 = vector.load %arg1[%c0_11, %c0_12] : memref<128x128xf32, #tpu.memory_space<vmem>>, vector<128x128xf32>
    %cst = arith.constant dense<0.000000e+00> : vector<8x128xf32>
    %53 = tpu.matmul %51, %52, %cst {dimension_numbers = #tpu.dot_dimension_numbers<[1], [0], [0], [1], [0, 0, 1, 1], [], []>} : vector<8x128xf32>, vector<128x128xf32>, vector<8x128xf32> -> vector<8x128xf32>
    %54 = tpu.reciprocal %53 {approx = true} : vector<8x128xf32> -> vector<8x128xf32>
    %55 = arith.mulf %51, %54 : vector<8x128xf32>
    %cst_13 = arith.constant 5.000000e-01 : f32
    %56 = vector.broadcast %cst_13 : f32 to vector<8x128xf32>
    %57 = arith.mulf %54, %56 : vector<8x128xf32>
    %58 = arith.cmpf oge, %55, %57 : vector<8x128xf32>
    %cst_14 = arith.constant 1.000000e+00 : f32
    %cst_15 = arith.constant 0.000000e+00 : f32
    %59 = vector.broadcast %cst_14 : f32 to vector<8x128xf32>
    %60 = vector.broadcast %cst_15 : f32 to vector<8x128xf32>
    %61 = arith.select %58, %59, %60 : vector<8x128xi1>, vector<8x128xf32>
    %62 = arith.subf %61, %55 : vector<8x128xf32>
    %63 = arith.addf %62, %55 : vector<8x128xf32>
    %c0_16 = arith.constant 0 : index
    %c0_17 = arith.constant 0 : index
    %64 = vector.load %arg3[%c0_16, %c0_17] : memref<8x128xf32, #tpu.memory_space<vmem>>, vector<8x128xf32>
    tpu.vector_store %arg3[%c0_16, %c0_17], %63 {strides = array<i32>} : memref<8x128xf32, #tpu.memory_space<vmem>>, vector<8x128xf32>,
    return
  }
  func.func @transform_0(%arg0: i32) -> (i32, i32) {
    %c0_i32 = arith.constant 0 : i32
    %c0_i32_0 = arith.constant 0 : i32
    %c0_i32_1 = arith.constant 0 : i32
    return %c0_i32, %c0_i32_0 : i32, i32
  }
  func.func @transform_1(%arg0: i32) -> (i32, i32) {
    %c0_i32 = arith.constant 0 : i32
    %c0_i32_0 = arith.constant 0 : i32
    return %arg0, %c0_i32 : i32, i32
  }
  func.func @transform_2(%arg0: i32) -> (i32, i32) {
    %c0_i32 = arith.constant 0 : i32
    %c0_i32_0 = arith.constant 0 : i32
    return %arg0, %c0_i32 : i32, i32
  }
}

</mosaic_0001>

<bundles_post_ra>
// kernel: tpu_custom_call.1
= control target key start
LH: loop header
LB: loop body
LE: loop exit
PB: predicated region body
PF: predicated region fallthrough
CT: control target
= control target key end

     0   :  { %7 = vsyncpa [#allocation3], 0  ;;  %s894_s0 = inlined_call_operand.hbm [shape: f32[128,128], index: 0, kind: input, shape index: {}]   ;;  %s895_s1 = inlined_call_operand.hbm [shape: f32[16,128], index: 1, kind: input, shape index: {}]   ;;  %s896_s2 = inlined_call_operand.hbm [shape: f32[16,128], index: 2, kind: output, shape index: {}]  }
   0x1   :  { %8 = vsyncpa [#allocation6], 0 }
   0x2   :  { %10 = vsyncpa [#allocation6 + $0x1], 0 }
   0x3   :  { %11 = vsyncpa [#allocation4], 0 }
   0x4   :  { %13 = vsyncpa [#allocation4 + $0x1], 0  ;;  %s706_s9 = smov 0   ;;  %s708_s10 = smov 0  }
   0x5   :  { %s710_s11 = smov 0   ;;  %s712_s12 = smov 0  }
   0x6 LB: > { %s727_s13 = sadd.s32 4294967295, %s674_s12   ;;  %s413_s14 = sadd.s32 4294967294, %s674_s12   ;;  %s674_s12 = sphi %s712_s12, %s918_s12   ;;  %s670_s11 = sphi %s710_s11, %s917_s11   ;;  %s666_s10 = sphi %s708_s10, %s916_s10   ;;  %s662_s9 = sphi %s706_s9, %s915_s9  }
   0x7   : > { %p60_p0 = scmp.ne.s32.totalorder %s666_s10, %s662_s9  ;;  %p897_p1 = scmp.eq.s32.totalorder %s727_s13, 0 }
   0x8   : > { %p90_p3 = scmp.eq.s32.totalorder %s413_s14, 1  ;;  %p414_p5 = scmp.ge.s32.totalorder %s674_s12, 1 }
   0x9   : > { %p736_p4 = por %p897_p1, %p60_p0  ;;  %p97_p7 = scmp.lt.s32.totalorder %s674_s12, 3 }
   0xa   : > { %p741_p6 = por %p90_p3, %p60_p0  ;;  %s676_s18 = smov [#allocation2]  }
   0xb   : > { %s901_s15 = scalar_select %p736_p4, 1, 0 }
   0xc   : > { %s902_s16 = scalar_select %p741_p6, 1, 0 }
   0xd   : > { %p746_p8 = pnand %p414_p5, %p97_p7  ;;  %s109_s19 = sshll.u32 %s676_s18, 4  ;;  %s110_s19 = int_to_ptr.vmem [resolvable:$true] %s109_s19 }
   0xe   : > { %s760_s21 = sadd.s32 1, %s674_s12   ;;  %s47_s22 = sadd.s32 1, %s670_s11 }
   0xf   : > { %s903_s17 = scalar_select %p746_p8, 1, 0 }
  0x10   : > { %p487_p9 = pneg %p746_p8  ;;  %s44_s23 = ssub.s32 %s674_s12, %s760_s21 }
  0x11   : > { %s563_s24 = scalar_lea.vmem %s110_s19, 2048  ;;  %p571_p5 = scmp.lt.s32.totalorder %s110_s19, %s110_s19 }
  0x12   : > { %p755_p11 = pnand %p487_p9, %p897_p1  ;;  %p564_p13 = scmp.ne.s32.totalorder %s110_s19, %s563_s24 }
  0x13   : > { %p572_p7 = scmp.lt.s32.totalorder %s563_s24, %s563_s24 }
  0x14   : > { %p554_p12 = pneg %p755_p11 }
  0x15   : > { %p573_p10 = por %p572_p7, %p571_p5 }
  0x16   : > { %p566_p0 = pnand %p564_p13, %p554_p12 }
  0x18   : > { %p567_p3 = pneg %p566_p0 }
  0x1a   : > { %p574_p2 = pnand %p573_p10, %p567_p3 }
  0x1c   : > { %577 = shalt.err (!%p574_p2)
}
  0x1d   : > { %s677_s25 = smov 128   ;;  %s678_s26 = smov 8  }
  0x1e   : > { %490 = dma.hbm_to_vmem [thread:$0]  (!%p755_p11), %s894_s0, 2048, %s110_s19, [#allocation3], %s677_s25, %s677_s25, %s678_s26  }
  0x1f   : > { %p45_p9 = scmp.eq.s32.totalorder %s44_s23, 0  ;;  %p54_p12 = scmp.ne.s32.totalorder %s670_s11, %s666_s10 }
  0x20   : > { %p55_p10 = scmp.eq.s32.totalorder %s674_s12, 0  ;;  %p500_p2 = scmp.lt.s32.totalorder %s674_s12, 2 }
  0x21   : > { %s777_s29 = scalar_select %p45_p9, %s670_s11, %s47_s22  }
  0x22   : > { %p56_p13 = por %p55_p10, %p54_p12  ;;  %p905_p0 = scmp.eq.s32.totalorder %s727_s13, 1 }
  0x23   : > { %s123_s3 = sand.u32 1, %s670_s11   ;;  %s418_s4 = sshll.u32 %s674_s12, 7 }
  0x24   : > { %p781_p3 = por %p905_p0, %p54_p12  ;;  %s417_s5 = sshll.u32 %s123_s3, 3 }
  0x25   : > { %s790_s8 = scalar_lea.hbm %s895_s1, %s418_s4  ;;  %s127_s14 = scalar_lea.vmem [#allocation5], %s417_s5 }
  0x26   : > { %s906_s30 = scalar_select %p781_p3, 1, 0 }
  0x27   : > { %s134_s18 = sshll.u32 %s127_s14, 4  ;;  %p792_p11 = pnand %p500_p2, %p56_p13  ;;  %s135_s18 = int_to_ptr.vmem [resolvable:$true] %s134_s18 }
  0x28   : > { %s124_s20 = scalar_lea.sflag [#allocation6], %s123_s3  ;;  %s578_s22 = scalar_lea.hbm %s790_s8, 128 }
  0x29   : > { %p579_p5 = scmp.ne.s32.totalorder %s790_s8, %s578_s22  ;;  %p580_p7 = pneg %p792_p11 }
  0x2a   : > { %s583_s25 = scalar_lea.hbm %s895_s1, 256  ;;  %p584_p10 = scmp.lt.s32.totalorder %s790_s8, %s895_s1 }
  0x2b   : > { %p581_p9 = pnand %p580_p7, %p579_p5  ;;  %p585_p2 = scmp.lt.s32.totalorder %s583_s25, %s578_s22 }
  0x2d   : > { %p582_p12 = pneg %p581_p9  ;;  %p586_p13 = por %p585_p2, %p584_p10 }
  0x2f   : > { %p587_p0 = pnand %p586_p13, %p582_p12 }
  0x31   : > { %590 = shalt.err (!%p587_p0)
}
  0x32   : > { %s591_s28 = scalar_lea.vmem %s135_s18, 128  ;;  %s679_s3 = smov [#allocation5]  }
  0x33   : > { %p592_p1 = scmp.ne.s32.totalorder %s135_s18, %s591_s28  ;;  %s596_s4 = sshll.u32 %s679_s3, 4  ;;  %s597_s4 = int_to_ptr.vmem [resolvable:$false] %s596_s4 }
  0x34   : > { %s598_s5 = scalar_lea.vmem %s597_s4, 256  ;;  %p599_p5 = scmp.lt.s32.totalorder %s135_s18, %s597_s4 }
  0x35   : > { %p594_p6 = pnand %p592_p1, %p580_p7  ;;  %p600_p9 = scmp.lt.s32.totalorder %s598_s5, %s591_s28 }
  0x37   : > { %p595_p3 = pneg %p594_p6  ;;  %p601_p4 = por %p600_p9, %p599_p5 }
  0x39   : > { %p602_p8 = pnand %p601_p4, %p595_p3 }
  0x3b   : > { %605 = shalt.err (!%p602_p8)
}
  0x3c   : > { %494 = dma.hbm_to_vmem [thread:$0]  (!%p792_p11), %s790_s8, 128, %s135_s18, %s124_s20  }
  0x3d   : > { %p908_p12 = scmp.ne.s32.totalorder %s903_s17, 0 }
  0x3e   : > { %p909_p10 = scmp.eq.s32.totalorder (!%p908_p12), %s727_s13, 0 }
  0x3f   : > { %143 = sbr.rel (%p908_p12) target bundleno = 800 (0x320), region = 28 }
  0x44   : > { %649 = dma.done.wait (%p909_p10), [#allocation3], 2048   ;;  %p910_p1 = pmov %p909_p10 }
  0x45   : > { %s817_s6 = sand.u32 1, %s666_s10   ;;  %p911_p4 = scmp.ne.s32.totalorder %s901_s15, 0 }
  0x46   : > { %651 = vsyncadd (%p910_p1), [#allocation3], 4294965248  ;;  %s421_s7 = sshll.u32 %s817_s6, 3  ;;  %s150_s14 = scalar_lea.sflag [#allocation6], %s817_s6 }
  0x47   : > { %s153_s8 = scalar_lea.vmem [#allocation5], %s421_s7 }
  0x48   : > { %653 = dma.done.wait (%p911_p4), %s150_s14, 128  }
  0x49   : > { %655 = vsyncadd (%p911_p4), %s150_s14, 4294967168  ;;  %v827_v0 = vld [vmem:[%s153_s8] sm:$0xff]  ;;  %s680_s17 = smov 1   ;;  %s681_s18 = smov 127   ;;  %v175_v1 = vlaneseq  ;;  %v238_v10 = vld [vmem:[#allocation2 + $0x78] sm:$0xff]  ;;  %v684_v11 = vmov 0.0  }
  0x4a   : > { %179 = vrot.lane.b32.xlu0 %v827_v0, %s680_s17  ;;  %s682_s15 = smov 2   ;;  %s683_s19 = smov 126   ;;  %444 = vmatprep.subr.mxu0 %v684_v11  ;;  %v237_v12 = vld [vmem:[#allocation2 + $0x70] sm:$0xff]  ;;  %v236_v14 = vld [vmem:[#allocation2 + $0x68] sm:$0xff]  ;;  %v235_v15 = vld [vmem:[#allocation2 + $0x60] sm:$0xff]  ;;  %vm687_vm3 = vmmov 0  }
  0x4b   : > { %v831_v2 = vand.u32 127, %v175_v1  ;;  %445 = vmatpush3.msra.mxu0 %v238_v10  ;;  %v234_v19 = vld [vmem:[#allocation2 + $0x58] sm:$0xff]  ;;  %s685_s20 = smov 124   ;;  %s686_s22 = smov 4   ;;  %v233_v21 = vld [vmem:[#allocation2 + $0x50] sm:$0xff]  ;;  %v232_v22 = vld [vmem:[#allocation2 + $0x48] sm:$0xff]  ;;  %476 = vmatprep.mubr.msk.f32.mxu0 %vm687_vm3, %v684_v11 }
  0x4c   : > { %446 = vmatprep.subr.mxu0 %v684_v11  ;;  %v231_v24 = vld [vmem:[#allocation2 + $0x40] sm:$0xff]  ;;  %v230_v25 = vld [vmem:[#allocation2 + $0x38] sm:$0xff]  ;;  %v229_v26 = vld [vmem:[#allocation2 + $0x30] sm:$0xff]  ;;  %s688_s23 = smov 120   ;;  %s689_s24 = smov 8  }
  0x4d   : > { %v177_v3 = vand.u32 1, %v831_v2  ;;  %v187_v8 = vshra.s32 %v831_v2, 1  ;;  %447 = vmatpush3.msra.mxu0 %v237_v12  ;;  %v198_v20 = vshra.s32 %v831_v2, 2  ;;  %v228_v27 = vld [vmem:[#allocation2 + $0x28] sm:$0xff]  ;;  %v227_v30 = vld [vmem:[#allocation2 + $0x20] sm:$0xff]  ;;  %v226_v33 = vld [vmem:[#allocation2 + $0x18] sm:$0xff] }
  0x4e   : > { %181 = vrot.lane.b32.xlu0 %v827_v0, %s681_s18  ;;  %448 = vmatprep.subr.mxu0 %v684_v11  ;;  %v225_v34 = vld [vmem:[#allocation2 + $0x10] sm:$0xff]  ;;  %v224_v35 = vld [vmem:[#allocation2 + $0x8] sm:$0xff]  ;;  %v223_v36 = vld [vmem:[#allocation2] sm:$0xff]  ;;  %v209_v37 = vshra.s32 %v831_v2, 3  ;;  %s424_s25 = sshll.u32 %s727_s13, 7  ;;  %s173_s26 = scalar_lea.vmem [#allocation7], %s421_s7 }
  0x4f   : > { %vm178_vm0 = vcmp.eq.s32.totalorder %v177_v3, 1  ;;  %v188_v9 = vand.u32 1, %v187_v8  ;;  %449 = vmatpush3.msra.mxu0 %v236_v14  ;;  %v199_v23 = vand.u32 1, %v198_v20  ;;  %s331_s27 = sshll.u32 %s173_s26, 4  ;;  %s329_s4 = scalar_lea.hbm %s896_s2, %s424_s25  ;;  %s332_s27 = int_to_ptr.vmem [resolvable:$true] %s331_s27 }
  0x50   : > { %450 = vmatprep.subr.mxu0 %v684_v11  ;;  %v210_v38 = vand.u32 1, %v209_v37  ;;  %s318_s5 = scalar_lea.sflag [#allocation4], %s817_s6  ;;  %s606_s14 = scalar_lea.vmem %s332_s27, 128 }
  0x51   : > { %vm189_vm1 = vcmp.eq.s32.totalorder %v188_v9, 1  ;;  %451 = vmatpush3.msra.mxu0 %v235_v15  ;;  %vm200_vm2 = vcmp.eq.s32.totalorder %v199_v23, 1  ;;  %p607_p6 = scmp.ne.s32.totalorder %s332_s27, %s606_s14  ;;  %p912_p8 = scmp.ne.s32.totalorder %s906_s30, 0 }
  0x52   : > { %452 = vmatprep.subr.mxu0 %v684_v11  ;;  %vm211_vm4 = vcmp.eq.s32.totalorder %v210_v38, 1  ;;  %s690_s8 = smov [#allocation7]  }
  0x53   : > { %453 = vmatpush3.msra.mxu0 %v234_v19  ;;  %p608_p3 = pnand %p607_p6, %p912_p8  ;;  %s610_s17 = sshll.u32 %s690_s8, 4  ;;  %s611_s17 = int_to_ptr.vmem [resolvable:$false] %s610_s17 }
  0x54   : > { %454 = vmatprep.subr.mxu0 %v684_v11  ;;  %s612_s13 = scalar_lea.vmem %s611_s17, 256  ;;  %p613_p7 = scmp.lt.s32.totalorder %s332_s27, %s611_s17 }
  0x55   : > { %455 = vmatpush3.msra.mxu0 %v233_v21  ;;  %p609_p11 = pneg %p608_p3  ;;  %p614_p2 = scmp.lt.s32.totalorder %s612_s13, %s606_s14 }
  0x56   : > { %456 = vmatprep.subr.mxu0 %v684_v11 }
  0x57   : > { %457 = vmatpush3.msra.mxu0 %v232_v22  ;;  %p615_p13 = por %p614_p2, %p613_p7 }
  0x58   : > { %458 = vmatprep.subr.mxu0 %v684_v11 }
  0x59   : > { %459 = vmatpush3.msra.mxu0 %v231_v24  ;;  %p616_p0 = pnand %p615_p13, %p609_p11 }
  0x5a   : > { %460 = vmatprep.subr.mxu0 %v684_v11 }
  0x5b   : > { %461 = vmatpush3.msra.mxu0 %v230_v25 }
  0x5c   : > { %462 = vmatprep.subr.mxu0 %v684_v11 }
  0x5d   : > { %463 = vmatpush3.msra.mxu0 %v229_v26 }
  0x5e   : > { %464 = vmatprep.subr.mxu0 %v684_v11 }
  0x5f   : > { %465 = vmatpush3.msra.mxu0 %v228_v27 }
  0x60   : > { %466 = vmatprep.subr.mxu0 %v684_v11 }
  0x61   : > { %467 = vmatpush3.msra.mxu0 %v227_v30 }
  0x62   : > { %468 = vmatprep.subr.mxu0 %v684_v11 }
  0x63   : > { %469 = vmatpush3.msra.mxu0 %v226_v33 }
  0x64   : > { %470 = vmatprep.subr.mxu0 %v684_v11 }
  0x65   : > { %471 = vmatpush3.msra.mxu0 %v225_v34 }
  0x66   : > { %472 = vmatprep.subr.mxu0 %v684_v11 }
  0x67   : > { %473 = vmatpush3.msra.mxu0 %v224_v35 }
  0x68   : > { %474 = vmatprep.subr.mxu0 %v684_v11 }
  0x69   : > { %475 = vmatpush3.msra.mxu0 %v223_v36 }
  0xbc   : > { %v180_v4 = vpop.permute.xlu0 %179 }
  0xc0   : > { %v182_v5 = vpop.permute.xlu0 %181 }
  0xc1   : > { %v185_v6 = vsel %vm178_vm0, %v180_v4, %v182_v5 }
  0xc2   : > { %v186_v7 = vmax.f32 %v827_v0, %v185_v6 }
  0xc4   : > { %190 = vrot.lane.b32.xlu1 %v186_v7, %s682_s15 }
  0xc8   : > { %192 = vrot.lane.b32.xlu1 %v186_v7, %s683_s19 }
 0x136   : > { %v191_v13 = vpop.permute.xlu1 %190 }
 0x13a   : > { %v193_v16 = vpop.permute.xlu1 %192 }
 0x13b   : > { %v196_v17 = vsel %vm189_vm1, %v191_v13, %v193_v16 }
 0x13c   : > { %v197_v18 = vmax.f32 %v186_v7, %v196_v17 }
 0x13e   : > { %203 = vrot.lane.b32.xlu1 %v197_v18, %s685_s20  ;;  %201 = vrot.lane.b32.xlu0 %v197_v18, %s686_s22 }
 0x1b0   : > { %v204_v28 = vpop.permute.xlu1 %203  ;;  %v202_v29 = vpop.permute.xlu0 %201 }
 0x1b1   : > { %v207_v31 = vsel %vm200_vm2, %v202_v29, %v204_v28 }
 0x1b2   : > { %v208_v32 = vmax.f32 %v197_v18, %v207_v31 }
 0x1b4   : > { %214 = vrot.lane.b32.xlu1 %v208_v32, %s688_s23  ;;  %212 = vrot.lane.b32.xlu0 %v208_v32, %s689_s24 }
 0x226   : > { %v215_v39 = vpop.permute.xlu1 %214  ;;  %v213_v40 = vpop.permute.xlu0 %212 }
 0x227   : > { %v218_v41 = vsel %vm211_vm4, %v213_v40, %v215_v39 }
 0x228   : > { %v219_v42 = vmax.f32 %v208_v32, %v218_v41 }
 0x22a   : > { %v220_v43 = vsub.f32 %v827_v0, %v219_v42 }
 0x22c   : > { %v221_v44 = vmul.f32 1.442695, %v220_v43 }
 0x22e   : > { %548 = vpow2.f32 %v221_v44 }
 0x23b   : > { %v549_v45 = vpop.eup %548 }
 0x23c   : > { %477 = vmatmul.mubr.f32.vlgmr.msra.gmra.mxu0 %v549_v45 }
 0x2fc   : > { %v305_v46 = vpop.f32.mrf.mxu0 }
 0x2fd   : > { %550 = vrcp.f32 %v305_v46 }
 0x2fe   : > { %v478_v47 = vpop.f32.mrf.mxu0 }
 0x30a   : > { %v551_v48 = vpop.eup %550 }
 0x30b   : > { %v310_v49 = vmul.f32 %v551_v48, %v549_v45  ;;  %v311_v50 = vmul.f32 0.5, %v551_v48 }
 0x30d   : > { %vm312_vm5 = vcmp.ge.f32.partialorder %v310_v49, %v311_v50 }
 0x30e   : > { %v313_v51 = vsel %vm312_vm5, 1.0, %v684_v11 }
 0x30f   : > { %v314_v52 = vsub.f32 %v313_v51, %v310_v49 }
 0x311   : > { %v315_v53 = vadd.f32 %v314_v52, %v310_v49 }
 0x313   : > { %316 = vst [vmem:[%s173_s26] sm:$0xff] %v315_v53 }
 0x314   : > { %619 = shalt.err (!%p616_p0)
}
 0x315   : > { %s620_s7 = scalar_lea.hbm %s329_s4, 128  ;;  %s624_s15 = scalar_lea.hbm %s896_s2, 256 }
 0x316   : > { %p621_p5 = scmp.ne.s32.totalorder %s329_s4, %s620_s7  ;;  %p625_p10 = scmp.lt.s32.totalorder %s329_s4, %s896_s2 }
 0x317   : > { %p626_p1 = scmp.lt.s32.totalorder %s624_s15, %s620_s7 }
 0x318   : > { %p622_p9 = pnand %p621_p5, %p912_p8 }
 0x319   : > { %p627_p4 = por %p626_p1, %p625_p10 }
 0x31a   : > { %p623_p12 = pneg %p622_p9 }
 0x31c   : > { %p628_p6 = pnand %p627_p4, %p623_p12 }
 0x31e   : > { %631 = shalt.err (!%p628_p6)
}
 0x31f   : > { %485 = dma.vmem_to_hbm [thread:$0]  (%p912_p8), %s332_s27, 128, %s329_s4, %s318_s5  }
 0x320 PF: > { %s343_s22 = sand.u32 1, %s662_s9   ;;  %p913_p3 = scmp.ne.s32.totalorder %s902_s16, 0 }
 0x321   : > { %p914_p11 = scmp.ge.s32.totalorder %s674_s12, 2  ;;  %s344_s23 = scalar_lea.sflag [#allocation4], %s343_s22 }
 0x323   : > { %p496_p7 = pnand %p914_p11, %p913_p3 }
 0x325   : > { %p497_p2 = pneg %p496_p7 }
 0x327   : > { %657 = dma.done.wait (%p497_p2), %s344_s23, 128  }
 0x328   : > { %659 = vsyncadd (%p497_p2), %s344_s23, 4294967168  ;;  %p16_p13 = scmp.ge.s32.totalorder %s760_s21, 4   ;;  %s915_s9 = smov %s666_s10 }
 0x329   : > { %s916_s10 = smov %s670_s11  ;;  %s917_s11 = smov %s777_s29 }
 0x32a   : > { %s918_s12 = smov %s760_s21  ;;  %18 = sbr.rel (!%p16_p13) target bundleno = 6 (0x6), region = 78 }
 0x32f   :  { %349 = vsyncpa [#allocation3], 1 }
 0x330   :  { %351 = vsyncpa [#allocation3 + $0x1], 1 }
 0x331   :  { %352 = vsyncpa [#allocation6], 1 }
 0x332   :  { %354 = vsyncpa [#allocation6 + $0x1], 1 }
 0x333   :  { %355 = vsyncpa [#allocation4], 1 }
 0x334   :  { %357 = vsyncpa [#allocation4 + $0x1], 1 }

</bundles_post_ra>
